<compile_context>
chip_gen: v7x
topology: tpu7x:2x2x1
jax: 0.10.0
libtpu: 0.0.40
codegen_flags: <defaults>
</compile_context>

<pallas_src>
import functools

import jax
import jax.numpy as jnp
from jax.experimental import pallas as pl
from jax.experimental.pallas import tpu as pltpu


def _se_block_kernel(x_ref, w1t_ref, w2t_ref, o_ref, *, hw_true):
    # x_ref:   (1, C, HWp)   one batch element (HWp = HW padded to mult. of 128)
    # w1t_ref: (C, Cr)       first Linear weight, pre-transposed (y = s @ W1.T)
    # w2t_ref: (Cr, C)       second Linear weight, pre-transposed
    # o_ref:   (1, C, HWp)
    _, C, HWp = x_ref.shape

    # --- Squeeze: avg + max pool over spatial (lane) axis, f32 accumulation ---
    xf = x_ref[...].astype(jnp.float32)                       # (1, C, HWp)
    if HWp != hw_true:
        lane = jax.lax.broadcasted_iota(jnp.int32, (1, C, HWp), 2)
        valid = lane < hw_true
        sum_x = jnp.sum(jnp.where(valid, xf, 0.0), axis=-1)   # (1, C)
        max_x = jnp.max(jnp.where(valid, xf, -jnp.inf), axis=-1)
    else:
        sum_x = jnp.sum(xf, axis=-1)
        max_x = jnp.max(xf, axis=-1)
    s = sum_x * (1.0 / float(hw_true)) + max_x                # (1, C)

    # --- Excite: Linear -> ReLU -> Linear -> Sigmoid (tiny, latency-only) ---
    h = jnp.dot(s, w1t_ref[...].astype(jnp.float32),
                preferred_element_type=jnp.float32)           # (1, Cr)
    h = jnp.maximum(h, 0.0)
    wgt = jax.nn.sigmoid(
        jnp.dot(h, w2t_ref[...].astype(jnp.float32),
                preferred_element_type=jnp.float32))          # (1, C)

    # --- Scale: re-read the ref (cheap vld) instead of holding xf live,
    #     and multiply in the input dtype (no whole-block upcast for bf16). ---
    o_ref[...] = (x_ref[...] * wgt[:, :, None].astype(x_ref.dtype)).astype(o_ref.dtype)


def se_block(x, w1, w2):
    """x: (B, C, H, W); w1: (C//r, C); w2: (C, C//r). Returns (B, C, H, W)."""
    B, C, H, W = x.shape
    HW = H * W
    HWp = max(128, pl.cdiv(HW, 128) * 128)          # lane-dense last dim

    x3 = x.reshape(B, C, HW)
    if HWp != HW:
        x3 = jnp.pad(x3, ((0, 0), (0, 0), (0, HWp - HW)))

    # Pre-transpose the (tiny, grid-invariant) weights once in XLA.
    w1t = jnp.transpose(w1)                          # (C, Cr)
    w2t = jnp.transpose(w2)                          # (Cr, C)
    Cr = w1.shape[0]

    x_itemsize = jnp.dtype(x.dtype).itemsize
    w_bytes = (w1t.size + w2t.size) * jnp.dtype(w1.dtype).itemsize

    # Per-step VMEM: double-buffered input + output blocks + resident weights.
    block_bytes = C * HWp * x_itemsize
    vmem_need = 4 * block_bytes + w_bytes + (2 << 20)
    vmem_limit = int(min(max(vmem_need, 16 << 20), 64 << 20))

    cost = pl.CostEstimate(
        flops=int(3 * B * C * HW + 4 * B * C * Cr),
        transcendentals=int(B * C),
        bytes_accessed=int(2 * B * C * HWp * x_itemsize + w_bytes),
    )

    kernel = functools.partial(_se_block_kernel, hw_true=HW)

    out3 = pl.pallas_call(
        kernel,
        out_shape=jax.ShapeDtypeStruct((B, C, HWp), x.dtype),
        grid_spec=pltpu.PrefetchScalarGridSpec(
            num_scalar_prefetch=0,
            grid=(B,),
            in_specs=[
                pl.BlockSpec((1, C, HWp), lambda b: (b, 0, 0)),
                pl.BlockSpec((C, Cr), lambda b: (0, 0)),
                pl.BlockSpec((Cr, C), lambda b: (0, 0)),
            ],
            out_specs=pl.BlockSpec((1, C, HWp), lambda b: (b, 0, 0)),
        ),
        compiler_params=pltpu.CompilerParams(
            dimension_semantics=("parallel",),
            vmem_limit_bytes=vmem_limit,
        ),
        cost_estimate=cost,
    )(x3, w1t, w2t)

    if HWp != HW:
        out3 = out3[:, :, :HW]
    return out3.reshape(B, C, H, W)


def se_block_ref(x, w1, w2):
    """Pure-JAX reference mirroring the PyTorch forward."""
    avg = jnp.mean(x, axis=(2, 3))
    mx = jnp.max(x, axis=(2, 3))
    s = avg + mx
    h = jnp.maximum(s @ w1.T, 0.0)
    w = jax.nn.sigmoid(h @ w2.T)
    return x * w[:, :, None, None]


if __name__ == "__main__":
    # Small shapes consistent with the module: reduction=16 needs C >= 16.
    B, C, H, W = 2, 64, 16, 16
    reduction = 16
    Cr = C // reduction

    key = jax.random.PRNGKey(0)
    kx, k1, k2 = jax.random.split(key, 3)

    x = jax.random.normal(kx, (B, C, H, W), dtype=jnp.float32)
    w1 = jax.random.normal(k1, (Cr, C), dtype=jnp.float32) * 0.1   # Linear(C -> Cr)
    w2 = jax.random.normal(k2, (C, Cr), dtype=jnp.float32) * 0.1   # Linear(Cr -> C)

    out = se_block(x, w1, w2)
    jax.block_until_ready(out)

    ref = se_block_ref(x, w1, w2)
    assert out.shape == (B, C, H, W)
    assert jnp.allclose(out, ref, atol=1e-5, rtol=1e-5), "mismatch vs reference"

    # Also exercise the padded-HW path (7x7 feature map, not a multiple of 128).
    xs = jax.random.normal(kx, (B, C, 7, 7), dtype=jnp.float32)
    out_s = se_block(xs, w1, w2)
    jax.block_until_ready(out_s)
    assert jnp.allclose(out_s, se_block_ref(xs, w1, w2), atol=1e-5, rtol=1e-5), \
        "mismatch vs reference (padded HW)"

    print("KERNEL_OK")
</pallas_src>

<mosaic_0001>
module attributes {stable_mosaic.version = 11 : i64} {
  func.func @_se_block_kernel(%arg0: i32, %arg1: memref<1x64x256xf32, #tpu.memory_space<vmem>>, %arg2: memref<64x4xf32, #tpu.memory_space<vmem>>, %arg3: memref<4x64xf32, #tpu.memory_space<vmem>>, %arg4: memref<1x64x256xf32, #tpu.memory_space<vmem>>) attributes {dimension_semantics = [#tpu.dimension_semantics<parallel>], iteration_bounds = array<i64: 2>, scalar_prefetch = 0 : i64, scratch_operands = 0 : i64, tpu.core_type = #tpu.core_type<tc>, window_params = [{transform_indices = @transform_0, window_bounds = array<i64: 1, 64, 256>}, {pipeline_mode = #tpu.pipeline_mode<synchronous>, transform_indices = @transform_1, window_bounds = array<i64: 64, 4>}, {pipeline_mode = #tpu.pipeline_mode<synchronous>, transform_indices = @transform_2, window_bounds = array<i64: 4, 64>}, {transform_indices = @transform_3, window_bounds = array<i64: 1, 64, 256>}]} {
    %c0 = arith.constant 0 : index
    %c0_0 = arith.constant 0 : index
    %c0_1 = arith.constant 0 : index
    %0 = vector.load %arg1[%c0, %c0_0, %c0_1] : memref<1x64x256xf32, #tpu.memory_space<vmem>>, vector<1x64x256xf32>
    %cst = arith.constant dense<0.000000e+00> : vector<1x64xf32>
    %1 = vector.multi_reduction <add>, %0, %cst [2] : vector<1x64x256xf32> to vector<1x64xf32>
    %cst_2 = arith.constant dense<0xFF800000> : vector<1x64xf32>
    %2 = vector.multi_reduction <maximumf>, %0, %cst_2 [2] : vector<1x64x256xf32> to vector<1x64xf32>
    %cst_3 = arith.constant 3.906250e-03 : f32
    %3 = vector.broadcast %cst_3 : f32 to vector<1x64xf32>
    %4 = arith.mulf %1, %3 : vector<1x64xf32>
    %5 = arith.addf %4, %2 : vector<1x64xf32>
    %c0_4 = arith.constant 0 : index
    %c0_5 = arith.constant 0 : index
    %6 = vector.load %arg2[%c0_4, %c0_5] : memref<64x4xf32, #tpu.memory_space<vmem>>, vector<64x4xf32>
    %cst_6 = arith.constant dense<0.000000e+00> : vector<1x4xf32>
    %7 = tpu.matmul %5, %6, %cst_6 {dimension_numbers = #tpu.dot_dimension_numbers<[1], [0], [0], [1], [0, 0, 1, 1], [], []>} : vector<1x64xf32>, vector<64x4xf32>, vector<1x4xf32> -> vector<1x4xf32>
    %cst_7 = arith.constant 0.000000e+00 : f32
    %8 = vector.broadcast %cst_7 : f32 to vector<1x4xf32>
    %9 = arith.maximumf %7, %8 : vector<1x4xf32>
    %c0_8 = arith.constant 0 : index
    %c0_9 = arith.constant 0 : index
    %10 = vector.load %arg3[%c0_8, %c0_9] : memref<4x64xf32, #tpu.memory_space<vmem>>, vector<4x64xf32>
    %cst_10 = arith.constant dense<0.000000e+00> : vector<1x64xf32>
    %11 = tpu.matmul %9, %10, %cst_10 {dimension_numbers = #tpu.dot_dimension_numbers<[1], [0], [0], [1], [0, 0, 1, 1], [], []>} : vector<1x4xf32>, vector<4x64xf32>, vector<1x64xf32> -> vector<1x64xf32>
    %12 = arith.negf %11 : vector<1x64xf32>
    %13 = math.exp %12 : vector<1x64xf32>
    %cst_11 = arith.constant 1.000000e+00 : f32
    %14 = vector.broadcast %cst_11 : f32 to vector<1x64xf32>
    %15 = arith.addf %14, %13 : vector<1x64xf32>
    %16 = arith.divf %14, %15 : vector<1x64xf32>
    %c0_12 = arith.constant 0 : index
    %c0_13 = arith.constant 0 : index
    %c0_14 = arith.constant 0 : index
    %17 = vector.load %arg1[%c0_12, %c0_13, %c0_14] : memref<1x64x256xf32, #tpu.memory_space<vmem>>, vector<1x64x256xf32>
    %18 = vector.shape_cast %16 : vector<1x64xf32> to vector<1x64x1xf32>
    %19 = vector.broadcast %18 : vector<1x64x1xf32> to vector<1x64x256xf32>
    %20 = arith.mulf %17, %19 : vector<1x64x256xf32>
    %c0_15 = arith.constant 0 : index
    %c0_16 = arith.constant 0 : index
    %c0_17 = arith.constant 0 : index
    %21 = vector.load %arg4[%c0_15, %c0_16, %c0_17] : memref<1x64x256xf32, #tpu.memory_space<vmem>>, vector<1x64x256xf32>
    tpu.vector_store %arg4[%c0_15, %c0_16, %c0_17], %20 {strides = array<i32>} : memref<1x64x256xf32, #tpu.memory_space<vmem>>, vector<1x64x256xf32>,
    return
  }
  func.func @transform_0(%arg0: i32) -> (i32, i32, i32) {
    %c0_i32 = arith.constant 0 : i32
    %c0_i32_0 = arith.constant 0 : i32
    %c0_i32_1 = arith.constant 0 : i32
    return %arg0, %c0_i32, %c0_i32_0 : i32, i32, i32
  }
  func.func @transform_1(%arg0: i32) -> (i32, i32) {
    %c0_i32 = arith.constant 0 : i32
    %c0_i32_0 = arith.constant 0 : i32
    %c0_i32_1 = arith.constant 0 : i32
    return %c0_i32, %c0_i32_0 : i32, i32
  }
  func.func @transform_2(%arg0: i32) -> (i32, i32) {
    %c0_i32 = arith.constant 0 : i32
    %c0_i32_0 = arith.constant 0 : i32
    %c0_i32_1 = arith.constant 0 : i32
    return %c0_i32, %c0_i32_0 : i32, i32
  }
  func.func @transform_3(%arg0: i32) -> (i32, i32, i32) {
    %c0_i32 = arith.constant 0 : i32
    %c0_i32_0 = arith.constant 0 : i32
    %c0_i32_1 = arith.constant 0 : i32
    return %arg0, %c0_i32, %c0_i32_0 : i32, i32, i32
  }
}

</mosaic_0001>

<bundles_post_ra>
// kernel: tpu_custom_call.1
= control target key start
LH: loop header
LB: loop body
LE: loop exit
PB: predicated region body
PF: predicated region fallthrough
CT: control target
= control target key end

     0   :  { %8 = vsyncpa [#allocation3], 0  ;;  %s1225_s0 = inlined_call_operand.hbm [shape: f32[2,64,256], index: 0, kind: input, shape index: {}]   ;;  %s1226_s1 = inlined_call_operand.vmem [shape: f32[64,4], index: 1, kind: input, shape index: {}]   ;;  %s1227_s2 = inlined_call_operand.vmem [shape: f32[4,64], index: 2, kind: input, shape index: {}]   ;;  %s1228_s3 = inlined_call_operand.hbm [shape: f32[2,64,256], index: 3, kind: output, shape index: {}]  }
   0x1   :  { %10 = vsyncpa [#allocation3 + $0x1], 0 }
   0x2   :  { %11 = vsyncpa [#allocation4], 0 }
   0x3   :  { %13 = vsyncpa [#allocation4 + $0x1], 0  ;;  %s904_s12 = smov 0   ;;  %s906_s13 = smov 0  }
   0x4   :  { %s908_s14 = smov 0   ;;  %s910_s15 = smov 0  }
   0x5 LB: > { %s925_s16 = sadd.s32 4294967295, %s873_s15   ;;  %s653_s17 = sadd.s32 4294967294, %s873_s15   ;;  %s873_s15 = sphi %s910_s15, %s1241_s15   ;;  %s869_s14 = sphi %s908_s14, %s1240_s14   ;;  %s865_s13 = sphi %s906_s13, %s1239_s13   ;;  %s861_s12 = sphi %s904_s12, %s1238_s12  }
   0x6   : > { %s929_s18 = sadd.s32 1, %s873_s15   ;;  %s26_s19 = sadd.s32 1, %s869_s14 }
   0x7   : > { %s23_s20 = ssub.s32 %s873_s15, %s929_s18  ;;  %p33_p0 = scmp.ne.s32.totalorder %s869_s14, %s865_s13 }
   0x8   : > { %p24_p1 = scmp.eq.s32.totalorder %s23_s20, 0  ;;  %p34_p2 = scmp.eq.s32.totalorder %s873_s15, 0 }
   0x9   : > { %p39_p3 = scmp.ne.s32.totalorder %s865_s13, %s861_s12  ;;  %p40_p4 = scmp.eq.s32.totalorder %s925_s16, 0 }
   0xa   : > { %s941_s21 = scalar_select %p24_p1, %s869_s14, %s26_s19  }
   0xb   : > { %p943_p5 = por %p34_p2, %p33_p0  ;;  %p947_p6 = por %p40_p4, %p39_p3 }
   0xc   : > { %p105_p7 = scmp.eq.s32.totalorder %s925_s16, 1  ;;  %p111_p8 = scmp.eq.s32.totalorder %s653_s17, 1 }
   0xd   : > { %p732_p10 = scmp.lt.s32.totalorder %s873_s15, 2  ;;  %s137_s26 = sand.u32 1, %s869_s14  }
   0xe   : > { %p954_p11 = por %p105_p7, %p33_p0  ;;  %p958_p12 = por %p111_p8, %p39_p3 }
   0xf   : > { %s671_s27 = sshll.u32 %s873_s15, 11  ;;  %s656_s28 = sshll.u32 %s137_s26, 7 }
  0x10   : > { %s1232_s24 = scalar_select %p954_p11, 1, 0 }
  0x11   : > { %s1233_s25 = scalar_select %p958_p12, 1, 0 }
  0x12   : > { %s967_s4 = scalar_lea.hbm %s1225_s0, %s671_s27  ;;  %s141_s5 = scalar_lea.vmem [#allocation2], %s656_s28 }
  0x13   : > { %s148_s6 = sshll.u32 %s141_s5, 4  ;;  %p971_p13 = pnand %p732_p10, %p943_p5  ;;  %s975_s6 = int_to_ptr.vmem [resolvable:$true] %s148_s6 }
  0x14   : > { %s977_s8 = scalar_lea.sflag [#allocation3], %s137_s26  ;;  %s777_s9 = scalar_lea.hbm %s967_s4, 2048 }
  0x15   : > { %p778_p0 = scmp.ne.s32.totalorder %s967_s4, %s777_s9  ;;  %p779_p1 = pneg %p971_p13 }
  0x16   : > { %s782_s17 = scalar_lea.hbm %s1225_s0, 4096  ;;  %p783_p4 = scmp.lt.u32.totalorder %s967_s4, %s1225_s0 }
  0x17   : > { %p780_p2 = pnand %p779_p1, %p778_p0  ;;  %p784_p5 = scmp.lt.u32.totalorder %s782_s17, %s777_s9 }
  0x18   : > { %p786_p8 = scmp.lt.u32.totalorder %s777_s9, %s967_s4 }
  0x19   : > { %p781_p3 = pneg %p780_p2  ;;  %p785_p7 = por %p784_p5, %p783_p4 }
  0x1b   : > { %p787_p10 = por %p786_p8, %p785_p7 }
  0x1d   : > { %p788_p9 = pnand %p787_p10, %p781_p3 }
  0x1f   : > { %791 = shalt.err (!%p788_p9)
}
  0x20   : > { %s792_s22 = scalar_lea.vmem %s975_s6, 2048  ;;  %s875_s26 = smov [#allocation2]  }
  0x21   : > { %p793_p0 = scmp.ne.s32.totalorder %s975_s6, %s792_s22  ;;  %s797_s27 = sshll.u32 %s875_s26, 4  ;;  %s798_s27 = int_to_ptr.vmem [resolvable:$false] %s797_s27 }
  0x22   : > { %s799_s28 = scalar_lea.vmem %s798_s27, 4096  ;;  %p800_p11 = scmp.lt.s32.totalorder %s975_s6, %s798_s27 }
  0x23   : > { %p795_p2 = pnand %p793_p0, %p779_p1  ;;  %p801_p4 = scmp.lt.s32.totalorder %s799_s28, %s792_s22 }
  0x25   : > { %p796_p12 = pneg %p795_p2  ;;  %p802_p5 = por %p801_p4, %p800_p11 }
  0x27   : > { %p803_p7 = pnand %p802_p5, %p796_p12 }
  0x29   : > { %806 = shalt.err (!%p803_p7)
}
  0x2a   : > { %s876_s29 = smov 256   ;;  %s877_s30 = smov 16  }
  0x2b   : > { %727 = dma.hbm_to_vmem [thread:$0]  (!%p971_p13), %s967_s4, 2048, %s975_s6, %s977_s8, %s876_s29, %s876_s29, %s877_s30  }
  0x2c   : > { %p659_p9 = scmp.ge.s32.totalorder %s873_s15, 1  ;;  %p156_p1 = scmp.lt.s32.totalorder %s873_s15, 3 }
  0x2e   : > { %p157_p3 = pnand %p659_p9, %p156_p1 }
  0x2f   : > { %s1008_s5 = sand.u32 (!%p157_p3), 1, %s865_s13  }
  0x30   : > { %160 = sbr.rel (%p157_p3) target bundleno = 838 (0x346), region = 32  ;;  %s660_s9 = sshll.u32 (!%p157_p3), %s1008_s5, 7 }
  0x31   : > { %s163_s10 = scalar_lea.sflag (!%p157_p3), [#allocation3], %s1008_s5  ;;  %s1014_s11 = scalar_lea.vmem (!%p157_p3), [#allocation2], %s660_s9 }
  0x37   : > { %852 = dma.done.wait (%p947_p6), %s163_s10, 2048  }
  0x38   : > { %854 = vsyncadd (%p947_p6), %s163_s10, 4294965248  ;;  %v1021_v0 = vld [vmem:[%s1014_s11 + $0x20] sm:$0xff]  ;;  %v1024_v1 = vld [vmem:[%s1014_s11 + $0x28] sm:$0xff]  ;;  %v878_v35 = vmov 0.0|0.0   ;;  %vm879_vm0 = vmmov 0   ;;  %v880_v45 = vmov 0.0   ;;  %v285_v50 = vlaneseq }
  0x39   : > { %v1027_v2 = vld [vmem:[%s1014_s11] sm:$0xff]  ;;  %v211_v3 = vadd.f32 %v1024_v1, %v1021_v0  ;;  %v1032_v4 = vld [vmem:[%s1014_s11 + $0x8] sm:$0xff]  ;;  %v1035_v5 = vld [vmem:[%s1014_s11 + $0x30] sm:$0xff]  ;;  %v235_v16 = vmax.f32 %v1021_v0, %v1024_v1  ;;  %708 = vmatprep.subr.bf16.mxu0 %v878_v35  ;;  %700 = vmatprep.mubr.msk.f32.mxu0 %vm879_vm0, %v880_v45  ;;  %vm296_vm1 = vcmask 130112   ;;  %vm303_vm2 = vcmask 195712   ;;  %s1144_s6 = scalar_lea.vmem [#allocation5], %s660_s9 }
  0x3a   : > { %v1038_v6 = vld [vmem:[%s1014_s11 + $0x38] sm:$0xff]  ;;  %v205_v7 = vadd.f32 %v1032_v4, %v1027_v2  ;;  %v1043_v8 = vld [vmem:[%s1014_s11 + $0x10] sm:$0xff]  ;;  %v229_v13 = vmax.f32 %v1027_v2, %v1032_v4  ;;  %v1057_v14 = vld [vmem:[%s1014_s11 + $0x40] sm:$0xff]  ;;  %703 = vmatprep.subr.mxu1 %v880_v45  ;;  %705 = vmatprep.mubr.msk.f32.mxu1 %vm879_vm0, %v880_v45  ;;  %v286_v53 = vand.u32 127, %v285_v50  ;;  %v1124_v56 = vshrl.u32 %v285_v50, 7  ;;  %s672_s9 = sshll.u32 %s925_s16, 11 }
  0x3b   : > { %v1046_v9 = vld [vmem:[%s1014_s11 + $0x18] sm:$0xff]  ;;  %212 = vadd.xlane.f32.xlu1 %v211_v3  ;;  %v214_v10 = vadd.f32 %v1038_v6, %v1035_v5  ;;  %v1060_v15 = vld [vmem:[%s1014_s11 + $0x48] sm:$0xff]  ;;  %v1067_v18 = vld [vmem:[%s1014_s11 + $0x50] sm:$0xff]  ;;  %v238_v20 = vmax.f32 %v1035_v5, %v1038_v6  ;;  %vm310_vm3 = vcmask 261312   ;;  %vm317_vm4 = vcmask 326912   ;;  %s580_s7 = sshll.u32 %s1144_s6, 4  ;;  %s1175_s19 = scalar_lea.hbm %s1228_s3, %s672_s9  ;;  %s1177_s7 = int_to_ptr.vmem [resolvable:$true] %s580_s7 }
  0x3c   : > { %206 = vadd.xlane.f32.xlu0 %v205_v7  ;;  %v208_v11 = vadd.f32 %v1046_v9, %v1043_v8  ;;  %v232_v12 = vmax.f32 %v1043_v8, %v1046_v9  ;;  %v217_v17 = vadd.f32 %v1060_v15, %v1057_v14  ;;  %v1070_v19 = vld [vmem:[%s1014_s11 + $0x58] sm:$0xff]  ;;  %v1077_v22 = vld [vmem:[%s1014_s11 + $0x60] sm:$0xff]  ;;  %v1080_v23 = vld [vmem:[%s1014_s11 + $0x68] sm:$0xff]  ;;  %v241_v24 = vmax.f32 %v1057_v14, %v1060_v15  ;;  %s567_s16 = scalar_lea.sflag [#allocation4], %s1008_s5  ;;  %s807_s20 = scalar_lea.vmem %s1177_s7, 2048 }
  0x3d   : > { %v220_v21 = vadd.f32 %v1070_v19, %v1067_v18  ;;  %v223_v25 = vadd.f32 %v1080_v23, %v1077_v22  ;;  %v1087_v26 = vld [vmem:[%s1014_s11 + $0x70] sm:$0xff]  ;;  %v1090_v27 = vld [vmem:[%s1014_s11 + $0x78] sm:$0xff]  ;;  %v244_v28 = vmax.f32 %v1067_v18, %v1070_v19  ;;  %v247_v31 = vmax.f32 %v1077_v22, %v1080_v23  ;;  %v269_v32 = vld [vmem:[%s1226_s1] sm:$0xff]  ;;  %p808_p6 = scmp.ne.s32.totalorder %s1177_s7, %s807_s20  ;;  %p1235_p11 = scmp.ne.s32.totalorder %s1232_s24, 0 }
  0x3e   : > { %v226_v29 = vadd.f32 %v1090_v27, %v1087_v26  ;;  %v250_v30 = vmax.f32 %v1087_v26, %v1090_v27  ;;  %v270_v33 = vld [vmem:[%s1226_s1 + $0x8] sm:$0xff]  ;;  %v271_v36 = vld [vmem:[%s1226_s1 + $0x10] sm:$0xff]  ;;  %v272_v37 = vld [vmem:[%s1226_s1 + $0x18] sm:$0xff]  ;;  %v291_v57 = vadd.s32 4294967288, %v286_v53  ;;  %v298_v60 = vadd.s32 4294967280, %v286_v53  ;;  %s881_s22 = smov [#allocation5]  }
  0x3f   : > { %215 = vadd.xlane.f32.xlu1 %v214_v10  ;;  %v709_v34 = vpack.c.bf16 %v270_v33, %v269_v32  ;;  %v712_v38 = vpack.c.bf16 %v272_v37, %v271_v36  ;;  %v273_v39 = vld [vmem:[%s1226_s1 + $0x20] sm:$0xff]  ;;  %v274_v40 = vld [vmem:[%s1226_s1 + $0x28] sm:$0xff]  ;;  %v275_v42 = vld [vmem:[%s1226_s1 + $0x30] sm:$0xff]  ;;  %v305_v63 = vadd.s32 4294967272, %v286_v53  ;;  %v289_v10 = vsub.s32 %v286_v53, %v1124_v56  ;;  %p809_p12 = pnand %p808_p6, %p1235_p11  ;;  %s811_s26 = sshll.u32 %s881_s22, 4  ;;  %s812_s26 = int_to_ptr.vmem [resolvable:$false] %s811_s26 }
  0x40   : > { %209 = vadd.xlane.f32.xlu0 %v208_v11  ;;  %v715_v41 = vpack.c.bf16 %v274_v40, %v273_v39  ;;  %v276_v43 = vld [vmem:[%s1226_s1 + $0x38] sm:$0xff]  ;;  %v294_v7 = vsub.s32 %v291_v57, %v1124_v56  ;;  %v312_v11 = vadd.s32 4294967264, %v286_v53  ;;  %v333_v32 = vadd.s32 4294967240, %v286_v53  ;;  %s813_s27 = scalar_lea.vmem %s812_s26, 4096  ;;  %p814_p8 = scmp.lt.s32.totalorder %s1177_s7, %s812_s26 }
  0x41   : > { %710 = vmatpush3.bf16.msra.mxu0 %v709_v34  ;;  %v718_v44 = vpack.c.bf16 %v276_v43, %v275_v42  ;;  %v326_v36 = vadd.s32 4294967248, %v286_v53  ;;  %vm324_vm5 = vcmask 392512   ;;  %vm331_vm6 = vcmask 458112   ;;  %p810_p13 = pneg %p809_p12  ;;  %p815_p10 = scmp.lt.s32.totalorder %s813_s27, %s807_s20 }
  0x42   : > { %711 = vmatprep.subr.bf16.mxu0 %v878_v35  ;;  %v315_v33 = vsub.s32 %v312_v11, %v1124_v56  ;;  %v336_v45 = vsub.s32 %v333_v32, %v1124_v56  ;;  %vm338_vm7 = vcmask 523712   ;;  %vm340_vm8 = vcmask 523264  }
  0x43   : > { %233 = vmax.xlane.f32.xlu1 %v232_v12  ;;  %vm419_vm9 = vcmask 1043456   ;;  %vm415_vm10 = vcmask 31744   ;;  %p816_p0 = por %p815_p10, %p814_p8 }
  0x44   : > { %230 = vmax.xlane.f32.xlu0 %v229_v13 }
  0x45   : > { %713 = vmatpush3.bf16.msra.mxu0 %v712_v38  ;;  %p817_p2 = pnand %p816_p0, %p810_p13 }
  0x46   : > { %714 = vmatprep.subr.bf16.mxu0 %v878_v35 }
  0x47   : > { %236 = vmax.xlane.f32.xlu1 %v235_v16 }
  0x48   : > { %218 = vadd.xlane.f32.xlu0 %v217_v17 }
  0x49   : > { %716 = vmatpush3.bf16.msra.mxu0 %v715_v41 }
  0x4a   : > { %717 = vmatprep.subr.bf16.mxu0 %v878_v35 }
  0x4b   : > { %239 = vmax.xlane.f32.xlu1 %v238_v20 }
  0x4c   : > { %221 = vadd.xlane.f32.xlu0 %v220_v21  ;;  %v319_v21 = vadd.s32 4294967256, %v286_v53 }
  0x4d   : > { %719 = vmatpush3.bf16.msra.mxu0 %v718_v44 }
  0x4e   : > { %v322_v39 = vsub.s32 %v319_v21, %v1124_v56  ;;  %v501_v21 = vsub.s32 0, %v1124_v56 }
  0x4f   : > { %242 = vmax.xlane.f32.xlu1 %v241_v24  ;;  %v301_v24 = vsub.s32 %v298_v60, %v1124_v56 }
  0x50   : > { %224 = vadd.xlane.f32.xlu0 %v223_v25 }
  0x53   : > { %245 = vmax.xlane.f32.xlu1 %v244_v28 }
  0x54   : > { %227 = vadd.xlane.f32.xlu0 %v226_v29  ;;  %v308_v29 = vsub.s32 %v305_v63, %v1124_v56 }
  0x57   : > { %251 = vmax.xlane.f32.xlu1 %v250_v30 }
  0x58   : > { %248 = vmax.xlane.f32.xlu0 %v247_v31 }
  0xc8   : > { %v213_v46 = vpop.xlane.xlu1 %212 }
  0xc9   : > { %v207_v47 = vpop.xlane.xlu0 %206  ;;  %v255_v3 = vmul.f32 0.00390625, %v213_v46 }
  0xca   : > { %v253_v61 = vmul.f32 0.00390625, %v207_v47 }
  0xcc   : > { %v216_v48 = vpop.xlane.xlu1 %215 }
  0xcd   : > { %v210_v49 = vpop.xlane.xlu0 %209  ;;  %v256_v13 = vmul.f32 0.00390625, %v216_v48 }
  0xce   : > { %v254_v62 = vmul.f32 0.00390625, %v210_v49  ;;  %v329_v49 = vsub.s32 %v326_v36, %v1124_v56 }
  0xd0   : > { %v234_v51 = vpop.xlane.xlu1 %233 }
  0xd1   : > { %v231_v52 = vpop.xlane.xlu0 %230  ;;  %v262_v16 = vadd.f32 %v254_v62, %v234_v51 }
  0xd2   : > { %v261_v17 = vadd.f32 %v253_v61, %v231_v52 }
  0xd3   : > { %v295_v37 = vrot.slane %v262_v16, %v294_v7 }
  0xd4   : > { %v237_v54 = vpop.xlane.xlu1 %236  ;;  %v290_v38 = vrot.slane %v261_v17, %v289_v10 }
  0xd5   : > { %v219_v55 = vpop.xlane.xlu0 %218  ;;  %v263_v25 = vadd.f32 %v255_v3, %v237_v54  ;;  %v414_v3 = vld [vmem:[%s1227_s2] sm:$0xf] }
  0xd6   : > { %v257_v28 = vmul.f32 0.00390625, %v219_v55  ;;  %v297_v50 = vsel %vm296_vm1, %v295_v37, %v290_v38  ;;  %704 = vmatpush3.msk.msra.mxu1 %vm419_vm9, %v414_v3 }
  0xd7   : > { %v302_v42 = vrot.slane %v263_v25, %v301_v24 }
  0xd8   : > { %v240_v58 = vpop.xlane.xlu1 %239 }
  0xd9   : > { %v222_v59 = vpop.xlane.xlu0 %221  ;;  %v264_v30 = vadd.f32 %v256_v13, %v240_v58  ;;  %v304_v54 = vsel %vm303_vm2, %v302_v42, %v297_v50 }
  0xda   : > { %v258_v31 = vmul.f32 0.00390625, %v222_v59 }
  0xdb   : > { %v309_v43 = vrot.slane %v264_v30, %v308_v29 }
  0xdc   : > { %v243_v12 = vpop.xlane.xlu1 %242 }
  0xdd   : > { %v225_v20 = vpop.xlane.xlu0 %224  ;;  %v265_v34 = vadd.f32 %v257_v28, %v243_v12  ;;  %v311_v57 = vsel %vm310_vm3, %v309_v43, %v304_v54 }
  0xde   : > { %v259_v47 = vmul.f32 0.00390625, %v225_v20 }
  0xdf   : > { %v316_v46 = vrot.slane %v265_v34, %v315_v33 }
  0xe0   : > { %v246_v35 = vpop.xlane.xlu1 %245 }
  0xe1   : > { %v266_v40 = vadd.f32 %v258_v31, %v246_v35  ;;  %v228_v41 = vpop.xlane.xlu0 %227  ;;  %v318_v59 = vsel %vm317_vm4, %v316_v46, %v311_v57 }
  0xe2   : > { %v260_v44 = vmul.f32 0.00390625, %v228_v41 }
  0xe3   : > { %v323_v51 = vrot.slane %v266_v40, %v322_v39 }
  0xe4   : > { %v252_v48 = vpop.xlane.xlu1 %251 }
  0xe5   : > { %v268_v52 = vadd.f32 %v260_v44, %v252_v48  ;;  %v249_v53 = vpop.xlane.xlu0 %248  ;;  %v325_v61 = vsel %vm324_vm5, %v323_v51, %v318_v59 }
  0xe6   : > { %v267_v55 = vadd.f32 %v259_v47, %v249_v53 }
  0xe7   : > { %v337_v58 = vrot.slane %v268_v52, %v336_v45 }
  0xe8   : > { %v330_v60 = vrot.slane %v267_v55, %v329_v49 }
  0xea   : > { %v332_v62 = vsel %vm331_vm6, %v330_v60, %v325_v61 }
  0xeb   : > { %v339_v63 = vsel %vm338_vm7, %v337_v58, %v332_v62 }
  0xec   : > { %701 = vmatmul.mubr.msk.f32.vlgmr.msra.gmra.mrb[0].mxu0 %vm340_vm8, %v339_v63 }
 0x1bf   : > { %v409_v7 = vpop.f32.mrb[0].mxu0 }
 0x1c0   : > { %v413_v10 = vmax.f32 %v409_v7, 0.0  ;;  %v702_v11 = vpop.f32.mrb[1].mxu0 }
 0x1c2   : > { %706 = vmatmul.mubr.msk.f32.vlgmr.msra.gmra.mrb[0].mxu1 %vm415_vm10, %v413_v10 }
 0x295   : > { %v489_v12 = vpop.f32.mrb[0].mxu1 }
 0x296   : > { %v665_v13 = vmul.f32 -1.442695, %v489_v12  ;;  %v707_v16 = vpop.f32.mrb[1].mxu1 }
 0x298   : > { %773 = vpow2.f32 %v665_v13 }
 0x2a2   : > { %v774_v17 = vpop.eup %773 }
 0x2a3   : > { %v496_v20 = vadd.f32 1.0, %v774_v17 }
 0x2a5   : > { %775 = vrcp.f32 %v496_v20 }
 0x2af   : > { %v776_v24 = vpop.eup %775 }
 0x2b0   : > { %v502_v25 = vrot.slane %v776_v24, %v501_v21 }
 0x2b2   : > { %508 = vbcast.lane.b32.xlu1 %v502_v25, 264  ;;  %504 = vbcast.lane.b32.xlu0 %v502_v25, 256 }
 0x2b6   : > { %512 = vbcast.lane.b32.xlu1 %v502_v25, 272  ;;  %520 = vbcast.lane.b32.xlu0 %v502_v25, 288 }
 0x2ba   : > { %516 = vbcast.lane.b32.xlu1 %v502_v25, 280  ;;  %528 = vbcast.lane.b32.xlu0 %v502_v25, 304 }
 0x2be   : > { %524 = vbcast.lane.b32.xlu1 %v502_v25, 296 }
 0x2c2   : > { %532 = vbcast.lane.b32.xlu1 %v502_v25, 312 }
 0x324   : > { %v509_v28 = vpop.permute.xlu1 %508  ;;  %v505_v29 = vpop.permute.xlu0 %504 }
 0x325   : > { %v536_v30 = vmul.f32 %v509_v28, %v1043_v8  ;;  %v537_v31 = vmul.f32 %v509_v28, %v1046_v9  ;;  %v534_v32 = vmul.f32 %v505_v29, %v1027_v2  ;;  %v535_v56 = vmul.f32 %v505_v29, %v1032_v4 }
 0x327   : > { %552 = vst [vmem:[%s1144_s6 + $0x10] sm:$0xff] %v536_v30  ;;  %553 = vst [vmem:[%s1144_s6 + $0x18] sm:$0xff] %v537_v31 }
 0x328   : > { %550 = vst [vmem:[%s1144_s6] sm:$0xff] %v534_v32  ;;  %551 = vst [vmem:[%s1144_s6 + $0x8] sm:$0xff] %v535_v56  ;;  %v513_v8 = vpop.permute.xlu1 %512  ;;  %v521_v2 = vpop.permute.xlu0 %520 }
 0x329   : > { %v538_v4 = vmul.f32 %v513_v8, %v1021_v0  ;;  %v539_v9 = vmul.f32 %v513_v8, %v1024_v1  ;;  %v542_v33 = vmul.f32 %v521_v2, %v1057_v14  ;;  %v543_v34 = vmul.f32 %v521_v2, %v1060_v15 }
 0x32b   : > { %554 = vst [vmem:[%s1144_s6 + $0x20] sm:$0xff] %v538_v4  ;;  %555 = vst [vmem:[%s1144_s6 + $0x28] sm:$0xff] %v539_v9 }
 0x32c   : > { %558 = vst [vmem:[%s1144_s6 + $0x40] sm:$0xff] %v542_v33  ;;  %559 = vst [vmem:[%s1144_s6 + $0x48] sm:$0xff] %v543_v34  ;;  %v517_v35 = vpop.permute.xlu1 %516  ;;  %v529_v36 = vpop.permute.xlu0 %528 }
 0x32d   : > { %v540_v0 = vmul.f32 %v517_v35, %v1035_v5  ;;  %v541_v37 = vmul.f32 %v517_v35, %v1038_v6  ;;  %v546_v1 = vmul.f32 %v529_v36, %v1077_v22  ;;  %v547_v14 = vmul.f32 %v529_v36, %v1080_v23 }
 0x32f   : > { %556 = vst [vmem:[%s1144_s6 + $0x30] sm:$0xff] %v540_v0  ;;  %557 = vst [vmem:[%s1144_s6 + $0x38] sm:$0xff] %v541_v37 }
 0x330   : > { %562 = vst [vmem:[%s1144_s6 + $0x60] sm:$0xff] %v546_v1  ;;  %563 = vst [vmem:[%s1144_s6 + $0x68] sm:$0xff] %v547_v14  ;;  %v525_v15 = vpop.permute.xlu1 %524 }
 0x331   : > { %v544_v38 = vmul.f32 %v525_v15, %v1067_v18  ;;  %v545_v39 = vmul.f32 %v525_v15, %v1070_v19 }
 0x333   : > { %560 = vst [vmem:[%s1144_s6 + $0x50] sm:$0xff] %v544_v38  ;;  %561 = vst [vmem:[%s1144_s6 + $0x58] sm:$0xff] %v545_v39 }
 0x334   : > { %v533_v5 = vpop.permute.xlu1 %532 }
 0x335   : > { %v548_v6 = vmul.f32 %v533_v5, %v1087_v26  ;;  %v549_v18 = vmul.f32 %v533_v5, %v1090_v27 }
 0x337   : > { %564 = vst [vmem:[%s1144_s6 + $0x70] sm:$0xff] %v548_v6  ;;  %565 = vst [vmem:[%s1144_s6 + $0x78] sm:$0xff] %v549_v18 }
 0x338   : > { %820 = shalt.err (!%p817_p2)
}
 0x339   : > { %s821_s28 = scalar_lea.hbm %s1175_s19, 2048  ;;  %s825_s10 = scalar_lea.hbm %s1228_s3, 4096 }
 0x33a   : > { %p822_p4 = scmp.ne.s32.totalorder %s1175_s19, %s821_s28  ;;  %p826_p9 = scmp.lt.u32.totalorder %s1175_s19, %s1228_s3 }
 0x33b   : > { %p827_p1 = scmp.lt.u32.totalorder %s825_s10, %s821_s28  ;;  %p829_p6 = scmp.lt.u32.totalorder %s821_s28, %s1175_s19 }
 0x33c   : > { %p823_p5 = pnand %p822_p4, %p1235_p11 }
 0x33d   : > { %p828_p3 = por %p827_p1, %p826_p9 }
 0x33e   : > { %p824_p7 = pneg %p823_p5 }
 0x33f   : > { %p830_p12 = por %p829_p6, %p828_p3 }
 0x341   : > { %p831_p13 = pnand %p830_p12, %p824_p7 }
 0x343   : > { %834 = shalt.err (!%p831_p13)
}
 0x344   : > { %s882_s4 = smov 256   ;;  %s883_s6 = smov 16  }
 0x345   : > { %722 = dma.vmem_to_hbm [thread:$0]  (%p1235_p11), %s1177_s7, 2048, %s1175_s19, %s567_s16, %s882_s4, %s882_s4, %s883_s6  }
 0x346 PF: > { %s595_s9 = sand.u32 1, %s861_s12   ;;  %p1236_p8 = scmp.ne.s32.totalorder %s1233_s25, 0 }
 0x347   : > { %p1237_p10 = scmp.ge.s32.totalorder %s873_s15, 2  ;;  %s596_s8 = scalar_lea.sflag [#allocation4], %s595_s9 }
 0x349   : > { %p729_p0 = pnand %p1237_p10, %p1236_p8 }
 0x34b   : > { %856 = dma.done.wait (!%p729_p0), %s596_s8, 2048  }
 0x34c   : > { %858 = vsyncadd (!%p729_p0), %s596_s8, 4294965248  ;;  %p16_p2 = scmp.ge.s32.totalorder %s929_s18, 4   ;;  %s1238_s12 = smov %s865_s13 }
 0x34d   : > { %s1239_s13 = smov %s869_s14  ;;  %s1240_s14 = smov %s941_s21 }
 0x34e   : > { %s1241_s15 = smov %s929_s18  ;;  %18 = sbr.rel (!%p16_p2) target bundleno = 5 (0x5), region = 77 }
 0x355   :  { %601 = vsyncpa [#allocation3], 1 }
 0x356   :  { %603 = vsyncpa [#allocation3 + $0x1], 1 }
 0x357   :  { %604 = vsyncpa [#allocation4], 1 }
 0x358   :  { %606 = vsyncpa [#allocation4 + $0x1], 1 }

</bundles_post_ra>
